<compile_context>
chip_gen: v7x
topology: tpu7x:2x2x1
jax: 0.10.0
libtpu: 0.0.40
codegen_flags: <defaults>
</compile_context>

<pallas_src>
import functools
import math

import jax
import jax.numpy as jnp
from jax.experimental import pallas as pl
from jax.experimental.pallas import tpu as pltpu

_VMEM_LIMIT = 32 * 1024 * 1024  # explicit scoped-VMEM budget; safe on v5e/v6e/v7x


# ----------------------------------------------------------------------------
# LayerNorm kernels (torch custom-module semantics: unbiased std, eps added to std)
# with optional fused residual add.
# ----------------------------------------------------------------------------
def _layernorm_packed_kernel(x_ref, *rest, eps, e, has_res):
    # x_ref: (tm, 128) tile; each vector row carries 128 // e logical LayerNorm rows.
    # gsum_ref: (128, 128) block-diagonal ones matrix (ones within each e-lane group).
    if has_res:
        r_ref, g_ref, b_ref, gsum_ref, o_ref = rest
    else:
        g_ref, b_ref, gsum_ref, o_ref = rest
    x = x_ref[...].astype(jnp.float32)
    if has_res:
        x = x + rest[0][...].astype(jnp.float32)
    gsum = gsum_ref[...]
    # Per-group mean / sum of squared deviations via the MXU: lanes stay dense,
    # no in-kernel reshapes, no masked partial stores.
    mean = jnp.dot(x, gsum, preferred_element_type=jnp.float32) * (1.0 / e)
    d = x - mean
    ssq = jnp.dot(d * d, gsum, preferred_element_type=jnp.float32)
    std = jnp.sqrt(ssq * (1.0 / (e - 1)))          # unbiased (N-1), matches torch.std
    inv = pl.reciprocal(std + eps, approx=False)   # exact; approx would exceed 1e-4 tolerance
    o_ref[...] = (d * inv * g_ref[...] + b_ref[...]).astype(o_ref.dtype)


def _layernorm_rows_kernel(x_ref, *rest, eps, has_res):
    # General path (embed >= 128 or not packable): x_ref is (tm, E).
    if has_res:
        r_ref, g_ref, b_ref, o_ref = rest
    else:
        g_ref, b_ref, o_ref = rest
    x = x_ref[...].astype(jnp.float32)
    if has_res:
        x = x + rest[0][...].astype(jnp.float32)
    e = x.shape[-1]
    mean = jnp.mean(x, axis=-1, keepdims=True)
    d = x - mean
    var = jnp.sum(d * d, axis=-1, keepdims=True) * (1.0 / (e - 1))
    inv = pl.reciprocal(jnp.sqrt(var) + eps, approx=False)
    o_ref[...] = (d * inv * g_ref[...] + b_ref[...]).astype(o_ref.dtype)


def layer_norm(x, gamma, beta, *, residual=None, eps=1e-10, block_rows=2048):
    """LayerNorm(x [+ residual]) over the last axis (torch-module semantics). embed >= 2."""
    orig_shape = x.shape
    e = orig_shape[-1]
    x2 = x.reshape(-1, e)
    rows = x2.shape[0]
    has_res = residual is not None
    r2 = residual.reshape(-1, e) if has_res else None
    g32 = gamma.astype(jnp.float32)
    b32 = beta.astype(jnp.float32)

    cparams = pltpu.CompilerParams(
        dimension_semantics=("parallel",),      # row grid shards across TCs (v7x megacore)
        vmem_limit_bytes=_VMEM_LIMIT,
    )

    pack = 128 // e if (e < 128 and 128 % e == 0) else 1
    if pack > 1 and rows % pack == 0:
        # Lane-dense path: fold `pack` logical rows into one 128-lane vector row.
        rp = rows // pack
        lanes = pack * e                        # == 128
        xs = x2.reshape(rp, lanes)              # contiguous row-major => free reshape
        gs = jnp.tile(g32, pack).reshape(1, lanes)
        bs = jnp.tile(b32, pack).reshape(1, lanes)
        lane = jnp.arange(lanes, dtype=jnp.int32)
        gsum = (lane[:, None] // e == lane[None, :] // e).astype(jnp.float32)
        tm = min(block_rows, rp)
        in_specs = [pl.BlockSpec((tm, lanes), lambda i: (i, 0))]
        operands = [xs]
        if has_res:
            in_specs.append(pl.BlockSpec((tm, lanes), lambda i: (i, 0)))
            operands.append(r2.reshape(rp, lanes))
        in_specs += [pl.BlockSpec((1, lanes), lambda i: (0, 0)),
                     pl.BlockSpec((1, lanes), lambda i: (0, 0)),
                     pl.BlockSpec((lanes, lanes), lambda i: (0, 0))]
        operands += [gs, bs, gsum]
        cost = pl.CostEstimate(
            flops=rows * e * 10 + 4 * rp * lanes * lanes,
            transcendentals=2 * rows,
            bytes_accessed=(2 + int(has_res)) * rows * e * 4 + (2 * lanes + lanes * lanes) * 4)
        # NOTE: ragged last block reads stale VMEM for padded rows; any inf/NaN produced there
        # is never written back (output writes are masked by the BlockSpec).
        out = pl.pallas_call(
            functools.partial(_layernorm_packed_kernel, eps=eps, e=e, has_res=has_res),
            out_shape=jax.ShapeDtypeStruct((rp, lanes), x.dtype),
            grid_spec=pltpu.PrefetchScalarGridSpec(
                num_scalar_prefetch=0,
                grid=(pl.cdiv(rp, tm),),
                in_specs=in_specs,
                out_specs=pl.BlockSpec((tm, lanes), lambda i: (i, 0)),
            ),
            compiler_params=cparams,
            cost_estimate=cost,
        )(*operands)
        return out.reshape(orig_shape)

    # General path: rows x E tiles, reduction over the lane axis.
    tm = min(block_rows, rows)
    in_specs = [pl.BlockSpec((tm, e), lambda i: (i, 0))]
    operands = [x2]
    if has_res:
        in_specs.append(pl.BlockSpec((tm, e), lambda i: (i, 0)))
        operands.append(r2)
    in_specs += [pl.BlockSpec((1, e), lambda i: (0, 0)),
                 pl.BlockSpec((1, e), lambda i: (0, 0))]
    operands += [g32.reshape(1, e), b32.reshape(1, e)]
    cost = pl.CostEstimate(
        flops=rows * e * 10, transcendentals=2 * rows,
        bytes_accessed=(2 + int(has_res)) * rows * e * 4 + 2 * e * 4)
    out = pl.pallas_call(
        functools.partial(_layernorm_rows_kernel, eps=eps, has_res=has_res),
        out_shape=jax.ShapeDtypeStruct((rows, e), x.dtype),
        grid_spec=pltpu.PrefetchScalarGridSpec(
            num_scalar_prefetch=0,
            grid=(pl.cdiv(rows, tm),),
            in_specs=in_specs,
            out_specs=pl.BlockSpec((tm, e), lambda i: (i, 0)),
        ),
        compiler_params=cparams,
        cost_estimate=cost,
    )(*operands)
    return out.reshape(orig_shape)


def layer_norm_ref(x, gamma, beta, *, residual=None, eps=1e-10):
    xf = x.astype(jnp.float32)
    if residual is not None:
        xf = xf + residual.astype(jnp.float32)
    mean = jnp.mean(xf, axis=-1, keepdims=True)
    d = xf - mean
    var = jnp.sum(d * d, axis=-1, keepdims=True) / (x.shape[-1] - 1)
    return (gamma * d / (jnp.sqrt(var) + eps) + beta).astype(x.dtype)


# ----------------------------------------------------------------------------
# Tiled fused linear (matmul + bias + optional ReLU), optional bf16 compute
# ----------------------------------------------------------------------------
def _linear_kernel(x_ref, w_ref, *rest, act, has_bias, compute_dtype):
    if has_bias:
        b_ref, o_ref, acc_ref = rest
    else:
        o_ref, acc_ref = rest
        b_ref = None
    k = pl.program_id(2)

    @pl.when(k == 0)
    def _():
        acc_ref[...] = jnp.zeros_like(acc_ref)

    x = x_ref[...].astype(compute_dtype)   # activations cast in-kernel; weights pre-cast
    acc_ref[...] += jnp.dot(x, w_ref[...], preferred_element_type=jnp.float32)

    @pl.when(k == pl.num_programs(2) - 1)
    def _():
        y = acc_ref[...]
        if has_bias:
            y = y + b_ref[...]              # bias add stays in f32
        if act == "relu":
            y = jnp.maximum(y, 0.0)
        o_ref[...] = y.astype(o_ref.dtype)


def linear(x, w, b=None, *, act=None, compute_dtype=jnp.float32,
           tm=256, tn=256, tk=512):
    """x: (..., din) @ w: (din, dout) (+ bias, + relu). Tiled (M, N, K) grid with a VMEM
    f32 accumulator; K is the innermost ("arbitrary") axis, M/N grid axes are parallel."""
    din, dout = w.shape
    orig = x.shape
    x2 = x.reshape(-1, din)
    M = x2.shape[0]
    has_bias = b is not None

    tm = min(tm, M)
    tn = min(tn, dout)
    tk_ = min(tk, din)
    if din % tk_ != 0:
        # K blocks must tile exactly (ragged K padding would corrupt the accumulator).
        tk_ = din  # TODO(synk): zero-pad K in HBM instead for very large non-divisible K.
    grid = (pl.cdiv(M, tm), pl.cdiv(dout, tn), din // tk_)

    wc = w.astype(compute_dtype)            # pre-cast weights once (halves weight traffic)
    in_specs = [pl.BlockSpec((tm, tk_), lambda i, j, k: (i, k)),
                pl.BlockSpec((tk_, tn), lambda i, j, k: (k, j))]
    operands = [x2, wc]
    if has_bias:
        in_specs.append(pl.BlockSpec((1, tn), lambda i, j, k: (0, j)))
        operands.append(b.astype(jnp.float32).reshape(1, dout))

    cost = pl.CostEstimate(
        flops=2 * M * dout * din,
        transcendentals=0,
        bytes_accessed=(M * din + din * dout + M * dout + (dout if has_bias else 0)) * 4)

    out = pl.pallas_call(
        functools.partial(_linear_kernel, act=act, has_bias=has_bias,
                          compute_dtype=compute_dtype),
        out_shape=jax.ShapeDtypeStruct((M, dout), x.dtype),
        grid_spec=pltpu.PrefetchScalarGridSpec(
            num_scalar_prefetch=0,
            grid=grid,
            in_specs=in_specs,
            out_specs=pl.BlockSpec((tm, tn), lambda i, j, k: (i, j)),
            scratch_shapes=[pltpu.VMEM((tm, tn), jnp.float32)]),
        compiler_params=pltpu.CompilerParams(
            dimension_semantics=("parallel", "parallel", "arbitrary"),
            vmem_limit_bytes=_VMEM_LIMIT),
        cost_estimate=cost,
    )(*operands)
    return out.reshape(orig[:-1] + (dout,))


def linear_ref(x, w, b=None, *, act=None, compute_dtype=jnp.float32):
    y = jnp.dot(x.astype(compute_dtype), w.astype(compute_dtype),
                preferred_element_type=jnp.float32,
                precision=jax.lax.Precision.HIGHEST)
    if b is not None:
        y = y + b.astype(jnp.float32)
    if act == "relu":
        y = jnp.maximum(y, 0.0)
    return y.astype(x.dtype)


# ----------------------------------------------------------------------------
# Fused (flash-style) attention kernel: QK^T, mask, online softmax, PV in one launch
# ----------------------------------------------------------------------------
def _flash_attn_kernel(q_ref, k_ref, v_ref, *rest, scale, has_mask):
    if has_mask:
        mask_ref, o_ref, m_sc, l_sc, acc_sc = rest
    else:
        o_ref, m_sc, l_sc, acc_sc = rest
        mask_ref = None
    ki = pl.program_id(3)

    @pl.when(ki == 0)
    def _():
        m_sc[...] = jnp.full_like(m_sc, -jnp.inf)
        l_sc[...] = jnp.zeros_like(l_sc)
        acc_sc[...] = jnp.zeros_like(acc_sc)

    q = q_ref[...].astype(jnp.float32)
    k = k_ref[...].astype(jnp.float32)
    s = jax.lax.dot_general(q, k, (((1,), (1,)), ((), ())),
                            preferred_element_type=jnp.float32) * scale
    if has_mask:
        s = jnp.where(mask_ref[...] == 0, -jnp.inf, s)

    m_prev = m_sc[...]
    m_new = jnp.maximum(m_prev, jnp.max(s, axis=-1, keepdims=True))
    # Guard against (-inf) - (-inf) for rows that are fully masked so far.
    m_safe = jnp.where(m_new == -jnp.inf, 0.0, m_new)
    alpha = jnp.exp(m_prev - m_safe)
    p = jnp.exp(s - m_safe)
    l_sc[...] = alpha * l_sc[...] + jnp.sum(p, axis=-1, keepdims=True)
    acc_sc[...] = alpha * acc_sc[...] + jnp.dot(
        p, v_ref[...].astype(jnp.float32), preferred_element_type=jnp.float32)
    m_sc[...] = m_new

    @pl.when(ki == pl.num_programs(3) - 1)
    def _():
        # Fully-masked rows end with l==0 -> NaN, matching torch's softmax-over-all(-inf).
        o_ref[...] = (acc_sc[...] * pl.reciprocal(l_sc[...], approx=False)).astype(o_ref.dtype)


def flash_attention(q, k, v, mask=None, *, scale):
    """q,k,v: (B, H, L, D); mask: (B, 1, Lq, Lk) int (0 = masked) or None."""
    B, H, Lq, D = q.shape
    Lk = k.shape[2]
    tq = Lq if Lq <= 128 else 128
    if Lq % tq != 0:
        tq = Lq  # TODO(synk): pad the q axis instead for large, non-multiple-of-128 Lq.
    tk = Lk if Lk <= 128 else 128
    if Lk % tk != 0:
        tk = Lk  # ragged kv blocks would let stale VMEM contaminate the softmax
    grid = (B, H, Lq // tq, Lk // tk)
    has_mask = mask is not None

    in_specs = [pl.BlockSpec((None, None, tq, D), lambda b, h, qi, ki: (b, h, qi, 0)),
                pl.BlockSpec((None, None, tk, D), lambda b, h, qi, ki: (b, h, ki, 0)),
                pl.BlockSpec((None, None, tk, D), lambda b, h, qi, ki: (b, h, ki, 0))]
    operands = [q, k, v]
    if has_mask:
        in_specs.append(pl.BlockSpec((None, None, tq, tk), lambda b, h, qi, ki: (b, 0, qi, ki)))
        operands.append(mask)

    cost = pl.CostEstimate(
        flops=B * H * Lq * Lk * (4 * D + 8),
        transcendentals=B * H * Lq * Lk,
        bytes_accessed=4 * (q.size + k.size + v.size + q.size) + (mask.size * 4 if has_mask else 0))

    return pl.pallas_call(
        functools.partial(_flash_attn_kernel, scale=scale, has_mask=has_mask),
        out_shape=jax.ShapeDtypeStruct((B, H, Lq, D), q.dtype),
        grid_spec=pltpu.PrefetchScalarGridSpec(
            num_scalar_prefetch=0,
            grid=grid,
            in_specs=in_specs,
            out_specs=pl.BlockSpec((None, None, tq, D), lambda b, h, qi, ki: (b, h, qi, 0)),
            scratch_shapes=[pltpu.VMEM((tq, 1), jnp.float32),
                            pltpu.VMEM((tq, 1), jnp.float32),
                            pltpu.VMEM((tq, D), jnp.float32)]),
        compiler_params=pltpu.CompilerParams(
            dimension_semantics=("parallel", "parallel", "parallel", "arbitrary"),
            vmem_limit_bytes=_VMEM_LIMIT),
        cost_estimate=cost,
    )(*operands)


def attention_ref(q, k, v, mask=None, *, scale):
    s = jnp.einsum("bhqd,bhkd->bhqk", q, k, precision=jax.lax.Precision.HIGHEST) * scale
    if mask is not None:
        s = jnp.where(mask == 0, -jnp.inf, s)
    p = jax.nn.softmax(s, axis=-1)
    return jnp.einsum("bhqk,bhkd->bhqd", p, v, precision=jax.lax.Precision.HIGHEST)


# ----------------------------------------------------------------------------
# Decoder forward (JAX orchestration around the Pallas kernels)
# ----------------------------------------------------------------------------
def _split_heads(x, heads):
    B, L, E = x.shape
    hd = E // heads
    return x.reshape(B, L, heads, hd).transpose(0, 2, 1, 3)


def _merge_heads(x):
    B, H, L, hd = x.shape
    return x.transpose(0, 2, 1, 3).reshape(B, L, H * hd)


def mhsa_self(p, x, mask, *, heads, lin, attn):
    E = x.shape[-1]
    qkv = lin(x, p["wqkv"])                       # fused q/k/v projection, one kernel
    q, k, v = qkv[..., :E], qkv[..., E:2 * E], qkv[..., 2 * E:]
    out = attn(_split_heads(q, heads), _split_heads(k, heads), _split_heads(v, heads),
               mask, scale=1.0 / math.sqrt(E // heads))
    return lin(_merge_heads(out), p["wo"], p["bo"])


def mhsa_cross(p, x, enc, mask, *, heads, lin, attn):
    E = x.shape[-1]
    q = lin(x, p["wq"])
    kv = lin(enc, p["wkv"])                       # fused k/v projection
    k, v = kv[..., :E], kv[..., E:]
    out = attn(_split_heads(q, heads), _split_heads(k, heads), _split_heads(v, heads),
               mask, scale=1.0 / math.sqrt(E // heads))
    return lin(_merge_heads(out), p["wo"], p["bo"])


def decoder_layer(p, enc, dec, p_mask, mask, *, heads, lin, ln, attn):
    # Dropouts are identity (inference). Residual adds are fused into the LN kernels.
    x = ln(mhsa_self(p["self"], dec, mask, heads=heads, lin=lin, attn=attn),
           p["g1"], p["b1"], residual=dec)
    x = ln(mhsa_cross(p["cross"], x, enc, p_mask, heads=heads, lin=lin, attn=attn),
           p["g2"], p["b2"], residual=x)
    h = lin(lin(x, p["w1"], p["bf1"], act="relu"), p["w2"], p["bf2"])
    x = ln(h, p["g3"], p["b3"], residual=x)
    return x


def decoder_forward(params, enc, dec_tokens, p_mask, mask, *, heads, lin, ln, attn):
    tok = params["emb"][dec_tokens]              # TokenEmbedding (padding_idx=1 row is zero)
    pos = params["pos"][: dec_tokens.shape[1]]   # PositionalEmbedding
    dec_emb = tok + pos[None, :, :]              # embedding dropout = identity
    x = dec_emb
    for lp in params["layers"]:
        # NOTE: matches the original module exactly -- every layer consumes the SAME embedded
        # `dec` (the loop never feeds x back), so only the last layer's output reaches `fc`.
        x = decoder_layer(lp, enc, dec_emb, p_mask, mask, heads=heads, lin=lin, ln=ln, attn=attn)
    return lin(x, params["wfc"], params["bfc"])


def make_positional_encoding(max_len, embed):
    pos = jnp.arange(max_len, dtype=jnp.float32)[:, None]
    two_i = jnp.arange(0, embed, 2, dtype=jnp.float32)
    angle = pos / jnp.power(10000.0, two_i / embed)
    enc = jnp.zeros((max_len, embed), jnp.float32)
    enc = enc.at[:, 0::2].set(jnp.sin(angle))
    enc = enc.at[:, 1::2].set(jnp.cos(angle))
    return enc


def init_params(key, vocab, embed, num_layers, heads, ffn_hidden, max_len):
    keys = jax.random.split(key, 64)
    it = iter(keys)

    def nrm(shape, scale=0.1):
        return jax.random.normal(next(it), shape, dtype=jnp.float32) * scale

    emb = nrm((vocab, embed), 0.5).at[1].set(0.0)   # padding_idx=1 row zeroed
    pos = make_positional_encoding(max_len, embed)

    def self_attn_params():
        return {"wqkv": nrm((embed, 3 * embed)), "wo": nrm((embed, embed)), "bo": nrm((embed,))}

    def cross_attn_params():
        return {"wq": nrm((embed, embed)), "wkv": nrm((embed, 2 * embed)),
                "wo": nrm((embed, embed)), "bo": nrm((embed,))}

    layers = []
    for _ in range(num_layers):
        layers.append({
            "self": self_attn_params(), "cross": cross_attn_params(),
            "g1": jnp.ones((embed,), jnp.float32), "b1": jnp.zeros((embed,), jnp.float32),
            "g2": jnp.ones((embed,), jnp.float32), "b2": jnp.zeros((embed,), jnp.float32),
            "g3": jnp.ones((embed,), jnp.float32), "b3": jnp.zeros((embed,), jnp.float32),
            "w1": nrm((embed, ffn_hidden)), "bf1": nrm((ffn_hidden,)),
            "w2": nrm((ffn_hidden, embed)), "bf2": nrm((embed,)),
        })
    return {"emb": emb, "pos": pos, "layers": layers,
            "wfc": nrm((embed, vocab)), "bfc": nrm((vocab,))}


if __name__ == "__main__":
    key = jax.random.PRNGKey(0)
    batch, seq, embed, heads = 2, 8, 32, 4
    ffn_hidden, vocab, num_layers, max_len = 64, 64, 2, 16
    k1, k2, k3, k4, k5, k6, k7, k8, k9, k10 = jax.random.split(key, 10)

    # --- LayerNorm packed lane-dense path (E=32) with fused residual ---
    x_ln = jax.random.normal(k1, (batch, seq, embed), dtype=jnp.float32)
    r_ln = jax.random.normal(k2, (batch, seq, embed), dtype=jnp.float32)
    g_ln = jax.random.normal(k3, (embed,), dtype=jnp.float32)
    b_ln = jax.random.normal(k4, (embed,), dtype=jnp.float32)
    y = jax.block_until_ready(layer_norm(x_ln, g_ln, b_ln, residual=r_ln))
    y_ref = layer_norm_ref(x_ln, g_ln, b_ln, residual=r_ln)
    assert y.shape == x_ln.shape
    assert jnp.allclose(y, y_ref, atol=1e-4, rtol=1e-4), "LayerNorm (packed+residual) mismatch"

    # --- LayerNorm rows path (E=256) ---
    x_big = jax.random.normal(k5, (4, 4, 256), dtype=jnp.float32)
    y_big = jax.block_until_ready(layer_norm(x_big, jnp.ones((256,)), jnp.zeros((256,))))
    y_big_ref = layer_norm_ref(x_big, jnp.ones((256,)), jnp.zeros((256,)))
    assert jnp.allclose(y_big, y_big_ref, atol=1e-4, rtol=1e-4), "LayerNorm (rows path) mismatch"

    # --- tiled bf16 linear at a non-trivial size (exercises the (M,N,K) grid + accumulator) ---
    xm = jax.random.normal(k6, (512, 384), dtype=jnp.float32)
    wm = jax.random.normal(k7, (384, 512), dtype=jnp.float32) * 0.05
    bm = jax.random.normal(k10, (512,), dtype=jnp.float32)
    ym = jax.block_until_ready(
        linear(xm, wm, bm, act="relu", compute_dtype=jnp.bfloat16, tm=256, tn=256, tk=128))
    ym_ref = linear_ref(xm, wm, bm, act="relu", compute_dtype=jnp.bfloat16)
    assert jnp.allclose(ym, ym_ref, atol=5e-3, rtol=5e-3), "tiled bf16 linear mismatch"

    # --- full Decoder forward (f32 compute: exact semantics vs full-precision reference) ---
    params = init_params(k8, vocab, embed, num_layers, heads, ffn_hidden, max_len)
    enc = jax.random.normal(k9, (batch, seq, embed), dtype=jnp.float32)
    dec_tok = jax.random.randint(jax.random.PRNGKey(42), (batch, seq), 0, vocab)
    causal = jnp.tril(jnp.ones((seq, seq), dtype=jnp.int32))[None, None]
    mask = jnp.broadcast_to(causal, (batch, 1, seq, seq))      # self-attn causal mask
    p_mask = jnp.ones((batch, 1, seq, seq), dtype=jnp.int32)   # cross-attn padding mask

    out = decoder_forward(params, enc, dec_tok, p_mask, mask, heads=heads,
                          lin=linear, ln=layer_norm, attn=flash_attention)
    out = jax.block_until_ready(out)
    ref = decoder_forward(params, enc, dec_tok, p_mask, mask, heads=heads,
                          lin=linear_ref, ln=layer_norm_ref, attn=attention_ref)
    assert out.shape == (batch, seq, vocab)
    assert jnp.allclose(out, ref, atol=1e-3, rtol=1e-3), "Decoder (f32) mismatch vs reference"

    # --- Decoder forward with bf16 matmul compute (review-recommended low-precision path) ---
    lin_bf16 = functools.partial(linear, compute_dtype=jnp.bfloat16)
    lin_ref_bf16 = functools.partial(linear_ref, compute_dtype=jnp.bfloat16)
    out_bf = decoder_forward(params, enc, dec_tok, p_mask, mask, heads=heads,
                             lin=lin_bf16, ln=layer_norm, attn=flash_attention)
    out_bf = jax.block_until_ready(out_bf)
    ref_bf = decoder_forward(params, enc, dec_tok, p_mask, mask, heads=heads,
                             lin=lin_ref_bf16, ln=layer_norm_ref, attn=attention_ref)
    assert jnp.allclose(out_bf, ref_bf, atol=1e-2, rtol=1e-2), "Decoder (bf16) mismatch vs reference"

    print("KERNEL_OK")
</pallas_src>

<mosaic_0001>
module attributes {stable_mosaic.version = 11 : i64} {
  func.func @_layernorm_packed_kernel(%arg0: i32, %arg1: memref<4x128xf32, #tpu.memory_space<vmem>>, %arg2: memref<4x128xf32, #tpu.memory_space<vmem>>, %arg3: memref<1x128xf32, #tpu.memory_space<vmem>>, %arg4: memref<1x128xf32, #tpu.memory_space<vmem>>, %arg5: memref<128x128xf32, #tpu.memory_space<vmem>>, %arg6: memref<4x128xf32, #tpu.memory_space<vmem>>) attributes {dimension_semantics = [#tpu.dimension_semantics<parallel>], iteration_bounds = array<i64: 1>, scalar_prefetch = 0 : i64, scratch_operands = 0 : i64, tpu.core_type = #tpu.core_type<tc>, window_params = [{transform_indices = @transform_0, window_bounds = array<i64: 4, 128>}, {transform_indices = @transform_1, window_bounds = array<i64: 4, 128>}, {pipeline_mode = #tpu.pipeline_mode<synchronous>, transform_indices = @transform_2, window_bounds = array<i64: 1, 128>}, {pipeline_mode = #tpu.pipeline_mode<synchronous>, transform_indices = @transform_3, window_bounds = array<i64: 1, 128>}, {pipeline_mode = #tpu.pipeline_mode<synchronous>, transform_indices = @transform_4, window_bounds = array<i64: 128, 128>}, {transform_indices = @transform_5, window_bounds = array<i64: 4, 128>}]} {
    %c0 = arith.constant 0 : index
    %c0_0 = arith.constant 0 : index
    %0 = vector.load %arg1[%c0, %c0_0] : memref<4x128xf32, #tpu.memory_space<vmem>>, vector<4x128xf32>
    %c0_1 = arith.constant 0 : index
    %c0_2 = arith.constant 0 : index
    %1 = vector.load %arg2[%c0_1, %c0_2] : memref<4x128xf32, #tpu.memory_space<vmem>>, vector<4x128xf32>
    %2 = arith.addf %0, %1 : vector<4x128xf32>
    %c0_3 = arith.constant 0 : index
    %c0_4 = arith.constant 0 : index
    %3 = vector.load %arg5[%c0_3, %c0_4] : memref<128x128xf32, #tpu.memory_space<vmem>>, vector<128x128xf32>
    %cst = arith.constant dense<0.000000e+00> : vector<4x128xf32>
    %4 = tpu.matmul %2, %3, %cst {dimension_numbers = #tpu.dot_dimension_numbers<[1], [0], [0], [1], [0, 0, 1, 1], [], []>} : vector<4x128xf32>, vector<128x128xf32>, vector<4x128xf32> -> vector<4x128xf32>
    %cst_5 = arith.constant 3.125000e-02 : f32
    %5 = vector.broadcast %cst_5 : f32 to vector<4x128xf32>
    %6 = arith.mulf %4, %5 : vector<4x128xf32>
    %7 = arith.subf %2, %6 : vector<4x128xf32>
    %8 = arith.mulf %7, %7 : vector<4x128xf32>
    %cst_6 = arith.constant dense<0.000000e+00> : vector<4x128xf32>
    %9 = tpu.matmul %8, %3, %cst_6 {dimension_numbers = #tpu.dot_dimension_numbers<[1], [0], [0], [1], [0, 0, 1, 1], [], []>} : vector<4x128xf32>, vector<128x128xf32>, vector<4x128xf32> -> vector<4x128xf32>
    %cst_7 = arith.constant 0.0322580636 : f32
    %10 = vector.broadcast %cst_7 : f32 to vector<4x128xf32>
    %11 = arith.mulf %9, %10 : vector<4x128xf32>
    %12 = math.sqrt %11 : vector<4x128xf32>
    %cst_8 = arith.constant 1.000000e-10 : f32
    %13 = vector.broadcast %cst_8 : f32 to vector<4x128xf32>
    %14 = arith.addf %12, %13 : vector<4x128xf32>
    %15 = tpu.reciprocal %14 : vector<4x128xf32> -> vector<4x128xf32>
    %16 = arith.mulf %7, %15 : vector<4x128xf32>
    %c0_9 = arith.constant 0 : index
    %c0_10 = arith.constant 0 : index
    %17 = vector.load %arg3[%c0_9, %c0_10] : memref<1x128xf32, #tpu.memory_space<vmem>>, vector<1x128xf32>
    %18 = vector.broadcast %17 : vector<1x128xf32> to vector<4x128xf32>
    %19 = arith.mulf %16, %18 : vector<4x128xf32>
    %c0_11 = arith.constant 0 : index
    %c0_12 = arith.constant 0 : index
    %20 = vector.load %arg4[%c0_11, %c0_12] : memref<1x128xf32, #tpu.memory_space<vmem>>, vector<1x128xf32>
    %21 = vector.broadcast %20 : vector<1x128xf32> to vector<4x128xf32>
    %22 = arith.addf %19, %21 : vector<4x128xf32>
    %c0_13 = arith.constant 0 : index
    %c0_14 = arith.constant 0 : index
    %23 = vector.load %arg6[%c0_13, %c0_14] : memref<4x128xf32, #tpu.memory_space<vmem>>, vector<4x128xf32>
    tpu.vector_store %arg6[%c0_13, %c0_14], %22 {strides = array<i32>} : memref<4x128xf32, #tpu.memory_space<vmem>>, vector<4x128xf32>,
    return
  }
  func.func @transform_0(%arg0: i32) -> (i32, i32) {
    %c0_i32 = arith.constant 0 : i32
    %c0_i32_0 = arith.constant 0 : i32
    return %arg0, %c0_i32 : i32, i32
  }
  func.func @transform_1(%arg0: i32) -> (i32, i32) {
    %c0_i32 = arith.constant 0 : i32
    %c0_i32_0 = arith.constant 0 : i32
    return %arg0, %c0_i32 : i32, i32
  }
  func.func @transform_2(%arg0: i32) -> (i32, i32) {
    %c0_i32 = arith.constant 0 : i32
    %c0_i32_0 = arith.constant 0 : i32
    %c0_i32_1 = arith.constant 0 : i32
    return %c0_i32, %c0_i32_0 : i32, i32
  }
  func.func @transform_3(%arg0: i32) -> (i32, i32) {
    %c0_i32 = arith.constant 0 : i32
    %c0_i32_0 = arith.constant 0 : i32
    %c0_i32_1 = arith.constant 0 : i32
    return %c0_i32, %c0_i32_0 : i32, i32
  }
  func.func @transform_4(%arg0: i32) -> (i32, i32) {
    %c0_i32 = arith.constant 0 : i32
    %c0_i32_0 = arith.constant 0 : i32
    %c0_i32_1 = arith.constant 0 : i32
    return %c0_i32, %c0_i32_0 : i32, i32
  }
  func.func @transform_5(%arg0: i32) -> (i32, i32) {
    %c0_i32 = arith.constant 0 : i32
    %c0_i32_0 = arith.constant 0 : i32
    return %arg0, %c0_i32 : i32, i32
  }
}

</mosaic_0001>

<bundles_post_ra>
// kernel: tpu_custom_call.1
= control target key start
LH: loop header
LB: loop body
LE: loop exit
PB: predicated region body
PF: predicated region fallthrough
CT: control target
= control target key end

     0   :  { %10 = vsyncpa [#allocation3], 0  ;;  %s618_s0 = inlined_call_operand.hbm [shape: f32[4,128], index: 0, kind: input, shape index: {}]   ;;  %s619_s1 = inlined_call_operand.hbm [shape: f32[4,128], index: 1, kind: input, shape index: {}]   ;;  %s620_s2 = inlined_call_operand.vmem [shape: f32[1,128], index: 2, kind: input, shape index: {}]   ;;  %s621_s3 = inlined_call_operand.vmem [shape: f32[1,128], index: 3, kind: input, shape index: {}]   ;;  %s622_s4 = inlined_call_operand.hbm [shape: f32[128,128], index: 4, kind: input, shape index: {}]   ;;  %s623_s5 = inlined_call_operand.hbm [shape: f32[4,128], index: 5, kind: output, shape index: {}]  }
   0x1   :  { %11 = vsyncpa [#allocation6], 0 }
   0x2   :  { %12 = vsyncpa [#allocation4], 0  ;;  %s525_s18 = smov [#allocation5]   ;;  %s526_s20 = smov [#allocation2]  }
   0x3   :  { %s29_s19 = sshll.u32 %s525_s18, 4  ;;  %s19_s21 = sshll.u32 %s526_s20, 4  ;;  %s30_s19 = int_to_ptr.vmem [resolvable:$true] %s29_s19  ;;  %s20_s21 = int_to_ptr.vmem [resolvable:$true] %s19_s21 }
   0x4   :  { %s431_s24 = scalar_lea.hbm %s619_s1, 64 }
   0x5   :  { %p432_p0 = scmp.ne.s32.totalorder %s619_s1, %s431_s24  ;;  %p435_p1 = scmp.lt.u32.totalorder %s431_s24, %s619_s1 }
   0x7   :  { %p437_p2 = pnand %p435_p1, %p432_p0 }
   0x9   :  { %440 = shalt.err (!%p437_p2)
}
   0xa   :  { %s441_s29 = scalar_lea.vmem %s30_s19, 64  ;;  %p446_p4 = scmp.lt.s32.totalorder %s30_s19, %s30_s19 }
   0xb   :  { %p442_p3 = scmp.ne.s32.totalorder %s30_s19, %s441_s29  ;;  %p447_p5 = scmp.lt.s32.totalorder %s441_s29, %s441_s29 }
   0xd   :  { %p448_p6 = por %p447_p5, %p446_p4 }
   0xf   :  { %p449_p7 = pnand %p448_p6, %p442_p3 }
  0x11   :  { %452 = shalt.err (!%p449_p7)
}
  0x12   :  { %32 = dma.hbm_to_vmem [thread:$0]  %s619_s1, 64, %s30_s19, [#allocation6]  }
  0x13   :  { %s453_s9 = scalar_lea.hbm %s618_s0, 64 }
  0x14   :  { %p454_p8 = scmp.ne.s32.totalorder %s618_s0, %s453_s9  ;;  %p457_p9 = scmp.lt.u32.totalorder %s453_s9, %s618_s0 }
  0x16   :  { %p459_p10 = pnand %p457_p9, %p454_p8 }
  0x18   :  { %462 = shalt.err (!%p459_p10)
}
  0x19   :  { %s463_s14 = scalar_lea.vmem %s20_s21, 64  ;;  %p468_p12 = scmp.lt.s32.totalorder %s20_s21, %s20_s21 }
  0x1a   :  { %p464_p11 = scmp.ne.s32.totalorder %s20_s21, %s463_s14  ;;  %p469_p13 = scmp.lt.s32.totalorder %s463_s14, %s463_s14 }
  0x1c   :  { %p470_p0 = por %p469_p13, %p468_p12 }
  0x1e   :  { %p471_p1 = pnand %p470_p0, %p464_p11 }
  0x20   :  { %474 = shalt.err (!%p471_p1)
}
  0x21   :  { %22 = dma.hbm_to_vmem [thread:$0]  %s618_s0, 64, %s20_s21, [#allocation3]  }
  0x22   :  { %s527_s16 = smov [#allocation7]   ;;  %s475_s20 = scalar_lea.hbm %s622_s4, 2048 }
  0x23   :  { %s42_s17 = sshll.u32 %s527_s16, 4  ;;  %p476_p2 = scmp.ne.s32.totalorder %s622_s4, %s475_s20  ;;  %s43_s17 = int_to_ptr.vmem [resolvable:$true] %s42_s17 }
  0x24   :  { %p479_p3 = scmp.lt.u32.totalorder %s475_s20, %s622_s4 }
  0x26   :  { %p481_p4 = pnand %p479_p3, %p476_p2 }
  0x28   :  { %484 = shalt.err (!%p481_p4)
}
  0x29   :  { %s485_s26 = scalar_lea.vmem %s43_s17, 2048  ;;  %p490_p6 = scmp.lt.s32.totalorder %s43_s17, %s43_s17 }
  0x2a   :  { %p486_p5 = scmp.ne.s32.totalorder %s43_s17, %s485_s26  ;;  %p491_p7 = scmp.lt.s32.totalorder %s485_s26, %s485_s26 }
  0x2c   :  { %p492_p8 = por %p491_p7, %p490_p6 }
  0x2e   :  { %p493_p9 = pnand %p492_p8, %p486_p5 }
  0x30   :  { %496 = shalt.err (!%p493_p9)
}
  0x31   :  { %s528_s0 = smov 128   ;;  %s529_s21 = smov 8  }
  0x32   :  { %48 = dma.hbm_to_vmem [thread:$0]  %s622_s4, 2048, %s43_s17, [#allocation6], %s528_s0, %s528_s0, %s529_s21  }
  0x33   :  { %519 = dma.done.wait [#allocation3], 64  }
  0x34   :  { %520 = vsyncadd [#allocation3], 4294967232 }
  0x35   :  { %521 = dma.done.wait [#allocation6], 2112  }
  0x36   :  { %522 = vsyncadd [#allocation6], 4294965184  ;;  %v530_v0 = vmov 0.0|0.0   ;;  %vm531_vm0 = vmmov 0   ;;  %v532_v1 = vmov 0.0   ;;  %v61_v2 = vld [vmem:[#allocation7] sm:$0xff] }
  0x37   :  { %370 = vmatprep.subr.bf16.mxu0 %v530_v0  ;;  %332 = vmatprep.mubr.msk.f32.mxu0 %vm531_vm0, %v532_v1  ;;  %v62_v3 = vld [vmem:[#allocation7 + $0x8] sm:$0xff]  ;;  %v63_v4 = vld [vmem:[#allocation7 + $0x10] sm:$0xff]  ;;  %v64_v6 = vld [vmem:[#allocation7 + $0x18] sm:$0xff]  ;;  %s533_s7 = smov [#allocation8]  }
  0x38   :  { %394 = vmatprep.subr.bf16.mxu1 %v530_v0  ;;  %367 = vmatprep.mubr.msk.f32.mxu1 %vm531_vm0, %v532_v1  ;;  %v371_v5 = vpack.c.bf16 %v62_v3, %v61_v2  ;;  %v374_v7 = vpack.c.bf16 %v64_v6, %v63_v4  ;;  %v65_v8 = vld [vmem:[#allocation7 + $0x20] sm:$0xff]  ;;  %v66_v9 = vld [vmem:[#allocation7 + $0x28] sm:$0xff]  ;;  %v67_v11 = vld [vmem:[#allocation7 + $0x30] sm:$0xff]  ;;  %s254_s8 = sshll.u32 %s533_s7, 4  ;;  %s255_s8 = int_to_ptr.vmem [resolvable:$true] %s254_s8 }
  0x39   :  { %v377_v10 = vpack.c.bf16 %v66_v9, %v65_v8  ;;  %v68_v12 = vld [vmem:[#allocation7 + $0x38] sm:$0xff]  ;;  %v69_v14 = vld [vmem:[#allocation7 + $0x40] sm:$0xff]  ;;  %v70_v15 = vld [vmem:[#allocation7 + $0x48] sm:$0xff]  ;;  %s497_s9 = scalar_lea.vmem %s255_s8, 64  ;;  %p502_p11 = scmp.lt.s32.totalorder %s255_s8, %s255_s8 }
  0x3a   :  { %372 = vmatpush3.bf16.msra.mxu0 %v371_v5  ;;  %396 = vmatpush3.bf16.msra.mxu1 %v371_v5  ;;  %v380_v13 = vpack.c.bf16 %v68_v12, %v67_v11  ;;  %v383_v16 = vpack.c.bf16 %v70_v15, %v69_v14  ;;  %v71_v17 = vld [vmem:[#allocation7 + $0x50] sm:$0xff]  ;;  %v72_v18 = vld [vmem:[#allocation7 + $0x58] sm:$0xff]  ;;  %v73_v20 = vld [vmem:[#allocation7 + $0x60] sm:$0xff]  ;;  %p498_p10 = scmp.ne.s32.totalorder %s255_s8, %s497_s9  ;;  %p503_p12 = scmp.lt.s32.totalorder %s497_s9, %s497_s9 }
  0x3b   :  { %373 = vmatprep.subr.bf16.mxu0 %v530_v0  ;;  %397 = vmatprep.subr.bf16.mxu1 %v530_v0  ;;  %v386_v19 = vpack.c.bf16 %v72_v18, %v71_v17  ;;  %v74_v21 = vld [vmem:[#allocation7 + $0x68] sm:$0xff]  ;;  %v75_v23 = vld [vmem:[#allocation7 + $0x70] sm:$0xff]  ;;  %v76_v24 = vld [vmem:[#allocation7 + $0x78] sm:$0xff] }
  0x3c   :  { %v389_v22 = vpack.c.bf16 %v74_v21, %v73_v20  ;;  %v392_v25 = vpack.c.bf16 %v76_v24, %v75_v23  ;;  %v58_v26 = vld [vmem:[#allocation2] sm:$0xf]  ;;  %v59_v27 = vld [vmem:[#allocation5] sm:$0xf]  ;;  %p504_p13 = por %p503_p12, %p502_p11 }
  0x3d   :  { %v60_v28 = vadd.f32 %v59_v27, %v58_v26  ;;  %v264_v44 = vld [vmem:[%s620_s2] ss:$0 sm:$0xff] }
  0x3e   :  { %375 = vmatpush3.bf16.msra.mxu0 %v374_v7  ;;  %399 = vmatpush3.bf16.msra.mxu1 %v374_v7  ;;  %v265_v46 = vld [vmem:[%s621_s3] ss:$0 sm:$0xff]  ;;  %p505_p0 = pnand %p504_p13, %p498_p10 }
  0x3f   :  { %376 = vmatprep.subr.bf16.mxu0 %v530_v0  ;;  %400 = vmatprep.subr.bf16.mxu1 %v530_v0 }
  0x42   :  { %378 = vmatpush3.bf16.msra.mxu0 %v377_v10  ;;  %402 = vmatpush3.bf16.msra.mxu1 %v377_v10 }
  0x43   :  { %379 = vmatprep.subr.bf16.mxu0 %v530_v0  ;;  %403 = vmatprep.subr.bf16.mxu1 %v530_v0 }
  0x46   :  { %381 = vmatpush3.bf16.msra.mxu0 %v380_v13  ;;  %405 = vmatpush3.bf16.msra.mxu1 %v380_v13 }
  0x47   :  { %382 = vmatprep.subr.bf16.mxu0 %v530_v0  ;;  %406 = vmatprep.subr.bf16.mxu1 %v530_v0 }
  0x4a   :  { %384 = vmatpush3.bf16.msra.mxu0 %v383_v16  ;;  %408 = vmatpush3.bf16.msra.mxu1 %v383_v16 }
  0x4b   :  { %385 = vmatprep.subr.bf16.mxu0 %v530_v0  ;;  %409 = vmatprep.subr.bf16.mxu1 %v530_v0 }
  0x4e   :  { %387 = vmatpush3.bf16.msra.mxu0 %v386_v19  ;;  %411 = vmatpush3.bf16.msra.mxu1 %v386_v19 }
  0x4f   :  { %388 = vmatprep.subr.bf16.mxu0 %v530_v0  ;;  %412 = vmatprep.subr.bf16.mxu1 %v530_v0 }
  0x52   :  { %390 = vmatpush3.bf16.msra.mxu0 %v389_v22  ;;  %414 = vmatpush3.bf16.msra.mxu1 %v389_v22 }
  0x53   :  { %391 = vmatprep.subr.bf16.mxu0 %v530_v0  ;;  %415 = vmatprep.subr.bf16.mxu1 %v530_v0 }
  0x56   :  { %393 = vmatpush3.bf16.msra.mxu0 %v392_v25  ;;  %417 = vmatpush3.bf16.msra.mxu1 %v392_v25 }
  0x59   :  { %333 = vmatmul.mubr.f32.vlgmr.msra.gmra.mrb[0].mxu0 %v60_v28 }
 0x12c   :  { %v143_v29 = vpop.f32.mrb[0].mxu0 }
 0x12d   :  { %v147_v30 = vmul.f32 0.03125, %v143_v29  ;;  %v334_v31 = vpop.f32.mrb[1].mxu0 }
 0x12f   :  { %v148_v32 = vsub.f32 %v60_v28, %v147_v30 }
 0x131   :  { %v149_v33 = vmul.f32 %v148_v32, %v148_v32 }
 0x133   :  { %368 = vmatmul.mubr.f32.vlgmr.msra.gmra.mrb[0].mxu1 %v149_v33 }
 0x206   :  { %v216_v34 = vpop.f32.mrb[0].mxu1 }
 0x207   :  { %v220_v35 = vmul.f32 0.032258064, %v216_v34  ;;  %v369_v36 = vpop.f32.mrb[1].mxu1 }
 0x209   :  { %427 = vrsqrt.f32 %v220_v35  ;;  %vm223_vm1 = vcmp.eq.f32.partialorder %v220_v35, inf  ;;  %v226_v39 = vand.u32 2147483648, %v220_v35  ;;  %vm225_vm2 = vcmp.eq.f32.partialorder %v220_v35, 0.0 }
 0x213   :  { %v428_v37 = vpop.eup %427 }
 0x214   :  { %v222_v38 = vmul.f32 %v428_v37, %v220_v35 }
 0x216   :  { %v224_v40 = vsel %vm223_vm1, %v220_v35, %v222_v38 }
 0x217   :  { %v227_v41 = vsel %vm225_vm2, %v226_v39, %v224_v40 }
 0x218   :  { %v228_v42 = vadd.f32 1e-10, %v227_v41 }
 0x21a   :  { %429 = vrcp.f32 %v228_v42 }
 0x224   :  { %v430_v43 = vpop.eup %429 }
 0x225   :  { %v230_v45 = vmul.f32 %v430_v43, %v148_v32 }
 0x227   :  { %v238_v47 = vmul.f32 %v264_v44, %v230_v45 }
 0x229   :  { %v246_v48 = vadd.f32 %v265_v46, %v238_v47 }
 0x22b   :  { %247 = vst [vmem:[#allocation8] sm:$0xf] %v246_v48 }
 0x22c   :  { %508 = shalt.err (!%p505_p0)
}
 0x22d   :  { %s509_s11 = scalar_lea.hbm %s623_s5, 64 }
 0x22e   :  { %p510_p1 = scmp.ne.s32.totalorder %s623_s5, %s509_s11  ;;  %p513_p2 = scmp.lt.u32.totalorder %s509_s11, %s623_s5 }
 0x230   :  { %p515_p3 = pnand %p513_p2, %p510_p1 }
 0x232   :  { %518 = shalt.err (!%p515_p3)
}
 0x233   :  { %257 = dma.vmem_to_hbm [thread:$0]  %s255_s8, 64, %s623_s5, [#allocation4]  }
 0x234   :  { %523 = dma.done.wait [#allocation4], 64  }
 0x235   :  { %524 = vsyncadd [#allocation4], 4294967232 }
 0x236   :  { %261 = vsyncpa [#allocation3], 1 }
 0x237   :  { %262 = vsyncpa [#allocation6], 1 }
 0x238   :  { %263 = vsyncpa [#allocation4], 1 }

</bundles_post_ra>
